<compile_context>
chip_gen: v7x
topology: tpu7x:2x2x1
jax: 0.10.0
libtpu: 0.0.40
codegen_flags: <defaults>
</compile_context>

<pallas_src>
import functools

import jax
import jax.numpy as jnp
from jax.experimental import pallas as pl
from jax.experimental.pallas import tpu as pltpu


def _navar_kernel(x_ref, a1_ref, b1_ref, rs_ref, w2_ref, b2_ref,
                  contrib_ref, pred_ref, absum_ref,
                  *, n_var, K, Lt, L, nvh, mask_tail):
    """One (batch, sequence-tile) grid step: the whole grouped causal TCN, all variables."""
    t = pl.program_id(1)
    f32 = jnp.float32
    nv2 = n_var * n_var
    KH = K * nvh

    # Layer 1 (grouped causal conv, single input channel per group) as ONE MXU matmul of the
    # wrapper-packed sparse weight matrix A1 against the stacked causally shifted copies of x.
    X = x_ref[0]                                                 # (S*n_var, Lt)
    h = jnp.dot(a1_ref[...], X, preferred_element_type=f32) + b1_ref[...]
    h = jnp.maximum(h, 0.0)                                      # (K*nvh, Lt)
    if K > 1:
        # Causal zero-padding of the hidden layer between the two conv layers: rows belonging
        # to hidden shift s2 must be zero at global positions < s2 (only matters on tile 0).
        gcol = t * Lt + jax.lax.broadcasted_iota(jnp.int32, (KH, Lt), 1)
        h = jnp.where(gcol >= rs_ref[...], h, 0.0)

    # Layer 2 + prediction rows ("sum over source variables" rows appended below the
    # contribution rows) fused into a single second MXU matmul.
    out = jnp.dot(w2_ref[...], h, preferred_element_type=f32) + b2_ref[...]
    contrib_ref[0] = out[:nv2]                                   # (n_var^2, Lt)
    pred_ref[0] = out[nv2:]                                      # (n_var,  Lt)

    # Per-(batch, tile) partial sum of |contributions| for the L1 regularizer.
    abs_c = jnp.abs(out[:nv2])
    if mask_tail:
        gcol_c = t * Lt + jax.lax.broadcasted_iota(jnp.int32, (nv2, Lt), 1)
        abs_c = jnp.where(gcol_c < L, abs_c, 0.0)
    absum_ref[0, 0] = jnp.sum(abs_c, keepdims=True)


def navar_forward(x, W1, b1, W2, b2, bias, lambda1, create_artifacts=False,
                  max_tile=1024):
    """NAVAR forward pass.  Returns (metrics, artifacts, prediction, contributions)."""
    B, n_var, L = x.shape
    n_var_w, K, hid, _ = W1.shape
    assert n_var_w == n_var
    assert max_tile % 128 == 0
    f32 = jnp.float32
    x = x.astype(f32)

    S = 2 * K - 1
    nv2 = n_var * n_var
    hid_p = ((hid + 7) // 8) * 8          # pad per-group hidden width to 8 sublanes
    nvh = n_var * hid_p

    # ---- sequence tiling: lane-dense tiles (multiple of 128) when L is large ----
    if L <= max_tile:
        Lt, T = L, 1
    else:
        Lt = max_tile
        T = -(-L // Lt)
    Lp = Lt * T
    mask_tail = (Lp != L)

    # ---- precompute the (2K-1) causally shifted copies of x once in HBM, so the kernel never
    #      concatenates / rotates lanes; the shifts also handle all cross-tile halos. ----
    xp = jnp.pad(x, ((0, 0), (0, 0), (0, Lp - L)))                         # (B, n_var, Lp)
    xsh = jnp.stack(
        [jnp.pad(xp, ((0, 0), (0, 0), (s, 0)))[..., :Lp] for s in range(S)], axis=1)
    xsh = xsh.reshape(B, S * n_var, Lp)     # row order: shift-major, then variable

    # ---- pack layer-1 as one sparse matrix A1: (K*nvh, S*n_var) ----
    # Row s2*nvh + g*hid_p + h is the hidden unit h of group g evaluated at global right-shift
    # s2; it reads input column (s2 + K-1-k1)*n_var + g with weight W1[g, k1, h].
    W1f = W1[..., 0].astype(f32)                                           # (n_var, K, hid)
    A1 = jnp.zeros((K * nvh, S * n_var), f32)
    for s2 in range(K):
        for k1 in range(K):
            s = s2 + (K - 1 - k1)
            for g in range(n_var):
                r0 = s2 * nvh + g * hid_p
                A1 = A1.at[r0:r0 + hid, s * n_var + g].set(W1f[g, k1])
    b1f = jnp.zeros((n_var, hid_p), f32).at[:, :hid].set(b1[..., 0].astype(f32))
    b1_full = jnp.tile(b1f.reshape(nvh, 1), (K, 1))                        # (K*nvh, 1)
    rs = jnp.repeat(jnp.arange(K, dtype=jnp.int32), nvh).reshape(K * nvh, 1)

    # ---- pack layer-2 (block-diagonal over groups) + appended prediction rows ----
    W2f = W2.astype(f32)                                                   # (n_var, K, n_var, hid)
    W2full = jnp.zeros((nv2 + n_var, K * nvh), f32)
    for s2 in range(K):
        k2 = K - 1 - s2
        for g in range(n_var):
            c0 = s2 * nvh + g * hid_p
            W2full = W2full.at[g * n_var:(g + 1) * n_var, c0:c0 + hid].set(W2f[g, k2])
    W2full = W2full.at[nv2:].set(
        W2full[:nv2].reshape(n_var, n_var, K * nvh).sum(axis=0))           # group-sum rows
    b2c = b2.reshape(nv2, 1).astype(f32)
    bpred = b2[..., 0].astype(f32).sum(axis=0).reshape(n_var, 1) \
        + jnp.asarray(bias, f32).reshape(n_var, 1)
    bfull = jnp.concatenate([b2c, bpred], axis=0)                          # (nv2+n_var, 1)

    kernel = functools.partial(_navar_kernel, n_var=n_var, K=K, Lt=Lt, L=L,
                               nvh=nvh, mask_tail=mask_tail)

    grid_spec = pltpu.PrefetchScalarGridSpec(
        num_scalar_prefetch=0,
        grid=(B, T),
        in_specs=[
            pl.BlockSpec((1, S * n_var, Lt), lambda b, t: (b, 0, t)),      # shifted x
            pl.BlockSpec((K * nvh, S * n_var), lambda b, t: (0, 0)),       # A1 (layer-1 matrix)
            pl.BlockSpec((K * nvh, 1), lambda b, t: (0, 0)),               # layer-1 bias
            pl.BlockSpec((K * nvh, 1), lambda b, t: (0, 0)),               # per-row causal shift
            pl.BlockSpec((nv2 + n_var, K * nvh), lambda b, t: (0, 0)),     # layer-2 + pred rows
            pl.BlockSpec((nv2 + n_var, 1), lambda b, t: (0, 0)),           # layer-2 + pred bias
        ],
        out_specs=[
            pl.BlockSpec((1, nv2, Lt), lambda b, t: (b, 0, t)),            # contributions
            pl.BlockSpec((1, n_var, Lt), lambda b, t: (b, 0, t)),          # prediction
            pl.BlockSpec((1, 1, 1, 1), lambda b, t: (b, t, 0, 0)),         # |c| partials
        ],
    )

    contrib_flat, pred_pad, abs_part = pl.pallas_call(
        kernel,
        grid_spec=grid_spec,
        out_shape=(
            jax.ShapeDtypeStruct((B, nv2, Lp), f32),
            jax.ShapeDtypeStruct((B, n_var, Lp), f32),
            jax.ShapeDtypeStruct((B, T, 1, 1), f32),
        ),
        compiler_params=pltpu.CompilerParams(
            dimension_semantics=("parallel", "parallel")),
    )(xsh, A1, b1_full, rs, W2full, bfull)

    contributions = contrib_flat[..., :L].reshape(B, n_var, n_var, L)
    prediction = pred_pad[..., :L]

    # loss = MSE(x[:,:,1:], pred[:,:,:-1]) + lambda1 * mean|contributions|
    if L > 1:
        mse = jnp.mean((x[:, :, 1:] - prediction[:, :, :-1]) ** 2)
    else:
        mse = jnp.float32(0.0)    # TODO(synk): L == 1 has no regression targets (degenerate)
    reg = lambda1 * jnp.sum(abs_part) / float(B * nv2 * L)
    loss = mse + reg

    metrics = {"loss": loss}
    artifacts = {}
    if create_artifacts:
        contrib_t = jnp.swapaxes(contributions, 1, 2)                  # (B, dst, src, L)
        artifacts["prediction"] = prediction
        artifacts["contributions"] = contrib_t
        cm = jnp.std(contrib_t, axis=-1, ddof=1).mean(axis=0)          # causal matrix (glue)
        cm = (cm - cm.min()) / (cm.max() - cm.min() + 1e-12)
        artifacts["matrix"] = cm
    return metrics, artifacts, prediction, contributions


def navar_reference(x, W1, b1, W2, b2, bias, lambda1):
    """Pure-JAX reference of the same forward semantics."""
    B, n_var, L = x.shape
    _, K, hid, _ = W1.shape
    x = x.astype(jnp.float32)
    x_pad = jnp.pad(x, ((0, 0), (0, 0), (K - 1, 0)))
    h = jnp.zeros((B, n_var, hid, L), jnp.float32)
    for k in range(K):
        h = h + W1[None, :, k, :, :] * x_pad[:, :, None, k:k + L]
    h = jnp.maximum(h + b1[None], 0.0)
    h_pad = jnp.pad(h, ((0, 0), (0, 0), (0, 0), (K - 1, 0)))
    c = jnp.zeros((B, n_var, n_var, L), jnp.float32)
    for k in range(K):
        c = c + jnp.einsum('gjh,bght->bgjt', W2[:, k], h_pad[:, :, :, k:k + L],
                           precision=jax.lax.Precision.HIGHEST)
    c = c + b2[None]
    pred = c.sum(axis=1) + bias[None]
    mse = jnp.mean((x[:, :, 1:] - pred[:, :, :-1]) ** 2)
    reg = lambda1 * jnp.mean(jnp.abs(c))
    return c, pred, mse + reg


if __name__ == "__main__":
    def make_params(key, n_var, hid, K):
        k1, k2, k3, k4, k5 = jax.random.split(key, 5)
        W1 = jax.random.normal(k1, (n_var, K, hid, 1), jnp.float32) * 0.3
        b1 = jax.random.normal(k2, (n_var, hid, 1), jnp.float32) * 0.1
        W2 = jax.random.normal(k3, (n_var, K, n_var, hid), jnp.float32) * 0.3
        b2 = jax.random.normal(k4, (n_var, n_var, 1), jnp.float32) * 0.1
        bias = jax.random.normal(k5, (n_var, 1), jnp.float32) * 0.01
        return W1, b1, W2, b2, bias

    LAMBDA1 = 0.1
    configs = [
        # (B, n_var, hidden, seq_len, K, max_tile)
        (2, 4, 8, 16, 2, 512),       # tiny, single tile
        (2, 4, 8, 1536, 2, 512),     # multi-tile, lane-dense 512-wide tiles
        (2, 3, 5, 200, 3, 128),      # K=3, hidden padded to 8, padded tail tile
        (2, 4, 8, 2100, 2, 1024),    # default-ish tile size, ragged tail
    ]

    key = jax.random.PRNGKey(0)
    for (B, NVAR, HIDDEN, SEQ, K, MT) in configs:
        key, kx, kp = jax.random.split(key, 3)
        x = jax.random.normal(kx, (B, NVAR, SEQ), jnp.float32)
        W1, b1, W2, b2, bias = make_params(kp, NVAR, HIDDEN, K)

        metrics, artifacts, pred, contrib = navar_forward(
            x, W1, b1, W2, b2, bias, LAMBDA1, create_artifacts=True, max_tile=MT)
        jax.block_until_ready((metrics["loss"], pred, contrib))

        c_ref, p_ref, loss_ref = navar_reference(x, W1, b1, W2, b2, bias, LAMBDA1)
        cfg = f"(B={B}, n_var={NVAR}, hid={HIDDEN}, L={SEQ}, K={K})"
        assert jnp.allclose(contrib, c_ref, atol=1e-3, rtol=1e-3), f"contributions mismatch {cfg}"
        assert jnp.allclose(pred, p_ref, atol=1e-3, rtol=1e-3), f"prediction mismatch {cfg}"
        assert jnp.allclose(metrics["loss"], loss_ref, atol=1e-3, rtol=1e-3), f"loss mismatch {cfg}"

    print("KERNEL_OK")
</pallas_src>

<mosaic_0001>
module attributes {stable_mosaic.version = 11 : i64} {
  func.func @_navar_kernel(%arg0: i32, %arg1: i32, %arg2: memref<1x12x16xf32, #tpu.memory_space<vmem>>, %arg3: memref<64x12xf32, #tpu.memory_space<vmem>>, %arg4: memref<64x1xf32, #tpu.memory_space<vmem>>, %arg5: memref<64x1xi32, #tpu.memory_space<vmem>>, %arg6: memref<20x64xf32, #tpu.memory_space<vmem>>, %arg7: memref<20x1xf32, #tpu.memory_space<vmem>>, %arg8: memref<1x16x16xf32, #tpu.memory_space<vmem>>, %arg9: memref<1x4x16xf32, #tpu.memory_space<vmem>>, %arg10: memref<1x1x1x1xf32, #tpu.memory_space<vmem>>) attributes {dimension_semantics = [#tpu.dimension_semantics<parallel>, #tpu.dimension_semantics<parallel>], iteration_bounds = array<i64: 2, 1>, scalar_prefetch = 0 : i64, scratch_operands = 0 : i64, tpu.core_type = #tpu.core_type<tc>, window_params = [{transform_indices = @transform_0, window_bounds = array<i64: 1, 12, 16>}, {pipeline_mode = #tpu.pipeline_mode<synchronous>, transform_indices = @transform_1, window_bounds = array<i64: 64, 12>}, {pipeline_mode = #tpu.pipeline_mode<synchronous>, transform_indices = @transform_2, window_bounds = array<i64: 64, 1>}, {pipeline_mode = #tpu.pipeline_mode<synchronous>, transform_indices = @transform_3, window_bounds = array<i64: 64, 1>}, {pipeline_mode = #tpu.pipeline_mode<synchronous>, transform_indices = @transform_4, window_bounds = array<i64: 20, 64>}, {pipeline_mode = #tpu.pipeline_mode<synchronous>, transform_indices = @transform_5, window_bounds = array<i64: 20, 1>}, {transform_indices = @transform_6, window_bounds = array<i64: 1, 16, 16>}, {transform_indices = @transform_7, window_bounds = array<i64: 1, 4, 16>}, {transform_indices = @transform_8, window_bounds = array<i64: 1, 1, 1, 1>}]} {
    %c0 = arith.constant 0 : index
    %c0_0 = arith.constant 0 : index
    %c0_1 = arith.constant 0 : index
    %0 = vector.load %arg2[%c0, %c0_0, %c0_1] : memref<1x12x16xf32, #tpu.memory_space<vmem>>, vector<1x12x16xf32>
    %1 = vector.shape_cast %0 : vector<1x12x16xf32> to vector<12x16xf32>
    %c0_2 = arith.constant 0 : index
    %c0_3 = arith.constant 0 : index
    %2 = vector.load %arg3[%c0_2, %c0_3] : memref<64x12xf32, #tpu.memory_space<vmem>>, vector<64x12xf32>
    %cst = arith.constant dense<0.000000e+00> : vector<64x16xf32>
    %3 = tpu.matmul %2, %1, %cst {dimension_numbers = #tpu.dot_dimension_numbers<[1], [0], [0], [1], [0, 0, 1, 1], [], []>} : vector<64x12xf32>, vector<12x16xf32>, vector<64x16xf32> -> vector<64x16xf32>
    %c0_4 = arith.constant 0 : index
    %c0_5 = arith.constant 0 : index
    %4 = vector.load %arg4[%c0_4, %c0_5] : memref<64x1xf32, #tpu.memory_space<vmem>>, vector<64x1xf32>
    %5 = vector.broadcast %4 : vector<64x1xf32> to vector<64x16xf32>
    %6 = arith.addf %3, %5 : vector<64x16xf32>
    %cst_6 = arith.constant 0.000000e+00 : f32
    %7 = vector.broadcast %cst_6 : f32 to vector<64x16xf32>
    %8 = arith.maximumf %6, %7 : vector<64x16xf32>
    %c16_i32 = arith.constant 16 : i32
    %9 = arith.muli %arg1, %c16_i32 : i32
    %10 = tpu.iota {dimensions = array<i32: 1>} : vector<64x16xi32>
    %11 = vector.broadcast %9 : i32 to vector<64x16xi32>
    %12 = arith.addi %11, %10 : vector<64x16xi32>
    %c0_7 = arith.constant 0 : index
    %c0_8 = arith.constant 0 : index
    %13 = vector.load %arg5[%c0_7, %c0_8] : memref<64x1xi32, #tpu.memory_space<vmem>>, vector<64x1xi32>
    %14 = vector.broadcast %13 : vector<64x1xi32> to vector<64x16xi32>
    %15 = arith.cmpi sge, %12, %14 : vector<64x16xi32>
    %cst_9 = arith.constant 0.000000e+00 : f32
    %16 = vector.broadcast %cst_9 : f32 to vector<64x16xf32>
    %17 = arith.select %15, %8, %16 : vector<64x16xi1>, vector<64x16xf32>
    %c0_10 = arith.constant 0 : index
    %c0_11 = arith.constant 0 : index
    %18 = vector.load %arg6[%c0_10, %c0_11] : memref<20x64xf32, #tpu.memory_space<vmem>>, vector<20x64xf32>
    %cst_12 = arith.constant dense<0.000000e+00> : vector<20x16xf32>
    %19 = tpu.matmul %18, %17, %cst_12 {dimension_numbers = #tpu.dot_dimension_numbers<[1], [0], [0], [1], [0, 0, 1, 1], [], []>} : vector<20x64xf32>, vector<64x16xf32>, vector<20x16xf32> -> vector<20x16xf32>
    %c0_13 = arith.constant 0 : index
    %c0_14 = arith.constant 0 : index
    %20 = vector.load %arg7[%c0_13, %c0_14] : memref<20x1xf32, #tpu.memory_space<vmem>>, vector<20x1xf32>
    %21 = vector.broadcast %20 : vector<20x1xf32> to vector<20x16xf32>
    %22 = arith.addf %19, %21 : vector<20x16xf32>
    %23 = vector.extract_strided_slice %22 {offsets = [0, 0], sizes = [16, 16], strides = [1, 1]} : vector<20x16xf32> to vector<16x16xf32>
    %c0_15 = arith.constant 0 : index
    %c0_16 = arith.constant 0 : index
    %c0_17 = arith.constant 0 : index
    %24 = vector.load %arg8[%c0_15, %c0_16, %c0_17] : memref<1x16x16xf32, #tpu.memory_space<vmem>>, vector<1x16x16xf32>
    %25 = vector.shape_cast %24 : vector<1x16x16xf32> to vector<16x16xf32>
    %26 = vector.shape_cast %23 : vector<16x16xf32> to vector<1x16x16xf32>
    tpu.vector_store %arg8[%c0_15, %c0_16, %c0_17], %26 {strides = array<i32>} : memref<1x16x16xf32, #tpu.memory_space<vmem>>, vector<1x16x16xf32>,
    %27 = vector.extract_strided_slice %22 {offsets = [16, 0], sizes = [4, 16], strides = [1, 1]} : vector<20x16xf32> to vector<4x16xf32>
    %c0_18 = arith.constant 0 : index
    %c0_19 = arith.constant 0 : index
    %c0_20 = arith.constant 0 : index
    %28 = vector.load %arg9[%c0_18, %c0_19, %c0_20] : memref<1x4x16xf32, #tpu.memory_space<vmem>>, vector<1x4x16xf32>
    %29 = vector.shape_cast %28 : vector<1x4x16xf32> to vector<4x16xf32>
    %30 = vector.shape_cast %27 : vector<4x16xf32> to vector<1x4x16xf32>
    tpu.vector_store %arg9[%c0_18, %c0_19, %c0_20], %30 {strides = array<i32>} : memref<1x4x16xf32, #tpu.memory_space<vmem>>, vector<1x4x16xf32>,
    %31 = vector.extract_strided_slice %22 {offsets = [0, 0], sizes = [16, 16], strides = [1, 1]} : vector<20x16xf32> to vector<16x16xf32>
    %32 = math.absf %31 : vector<16x16xf32>
    %33 = vector.shape_cast %32 : vector<16x16xf32> to vector<1x16x16xf32>
    %cst_21 = arith.constant dense<0.000000e+00> : vector<1xf32>
    %34 = vector.multi_reduction <add>, %33, %cst_21 [1, 2] : vector<1x16x16xf32> to vector<1xf32>
    %35 = vector.shape_cast %34 : vector<1xf32> to vector<1x1x1xf32>
    %36 = vector.extract %35[0, 0, 0] : f32 from vector<1x1x1xf32>
    %37 = vector.broadcast %36 : f32 to vector<1x1xf32>
    %c0_22 = arith.constant 0 : index
    %c0_23 = arith.constant 0 : index
    %c0_24 = arith.constant 0 : index
    %c0_25 = arith.constant 0 : index
    %38 = vector.load %arg10[%c0_22, %c0_23, %c0_24, %c0_25] : memref<1x1x1x1xf32, #tpu.memory_space<vmem>>, vector<1x1x1x1xf32>
    %39 = vector.shape_cast %38 : vector<1x1x1x1xf32> to vector<1x1xf32>
    %40 = vector.shape_cast %37 : vector<1x1xf32> to vector<1x1x1x1xf32>
    tpu.vector_store %arg10[%c0_22, %c0_23, %c0_24, %c0_25], %40 {strides = array<i32>} : memref<1x1x1x1xf32, #tpu.memory_space<vmem>>, vector<1x1x1x1xf32>,
    return
  }
  func.func @transform_0(%arg0: i32, %arg1: i32) -> (i32, i32, i32) {
    %c0_i32 = arith.constant 0 : i32
    %c0_i32_0 = arith.constant 0 : i32
    return %arg0, %c0_i32, %arg1 : i32, i32, i32
  }
  func.func @transform_1(%arg0: i32, %arg1: i32) -> (i32, i32) {
    %c0_i32 = arith.constant 0 : i32
    %c0_i32_0 = arith.constant 0 : i32
    %c0_i32_1 = arith.constant 0 : i32
    return %c0_i32, %c0_i32_0 : i32, i32
  }
  func.func @transform_2(%arg0: i32, %arg1: i32) -> (i32, i32) {
    %c0_i32 = arith.constant 0 : i32
    %c0_i32_0 = arith.constant 0 : i32
    %c0_i32_1 = arith.constant 0 : i32
    return %c0_i32, %c0_i32_0 : i32, i32
  }
  func.func @transform_3(%arg0: i32, %arg1: i32) -> (i32, i32) {
    %c0_i32 = arith.constant 0 : i32
    %c0_i32_0 = arith.constant 0 : i32
    %c0_i32_1 = arith.constant 0 : i32
    return %c0_i32, %c0_i32_0 : i32, i32
  }
  func.func @transform_4(%arg0: i32, %arg1: i32) -> (i32, i32) {
    %c0_i32 = arith.constant 0 : i32
    %c0_i32_0 = arith.constant 0 : i32
    %c0_i32_1 = arith.constant 0 : i32
    return %c0_i32, %c0_i32_0 : i32, i32
  }
  func.func @transform_5(%arg0: i32, %arg1: i32) -> (i32, i32) {
    %c0_i32 = arith.constant 0 : i32
    %c0_i32_0 = arith.constant 0 : i32
    %c0_i32_1 = arith.constant 0 : i32
    return %c0_i32, %c0_i32_0 : i32, i32
  }
  func.func @transform_6(%arg0: i32, %arg1: i32) -> (i32, i32, i32) {
    %c0_i32 = arith.constant 0 : i32
    %c0_i32_0 = arith.constant 0 : i32
    return %arg0, %c0_i32, %arg1 : i32, i32, i32
  }
  func.func @transform_7(%arg0: i32, %arg1: i32) -> (i32, i32, i32) {
    %c0_i32 = arith.constant 0 : i32
    %c0_i32_0 = arith.constant 0 : i32
    return %arg0, %c0_i32, %arg1 : i32, i32, i32
  }
  func.func @transform_8(%arg0: i32, %arg1: i32) -> (i32, i32, i32, i32) {
    %c0_i32 = arith.constant 0 : i32
    %c0_i32_0 = arith.constant 0 : i32
    %c0_i32_1 = arith.constant 0 : i32
    return %arg0, %arg1, %c0_i32, %c0_i32_0 : i32, i32, i32, i32
  }
}

</mosaic_0001>

<bundles_post_ra>
// kernel: tpu_custom_call.1
= control target key start
LH: loop header
LB: loop body
LE: loop exit
PB: predicated region body
PF: predicated region fallthrough
CT: control target
= control target key end

     0   :  { %s1563_s0 = inlined_call_operand.vmem [shape: f32[2,12,16], index: 0, kind: input, shape index: {}]   ;;  %s1564_s1 = inlined_call_operand.vmem [shape: f32[64,12], index: 1, kind: input, shape index: {}]   ;;  %s1565_s2 = inlined_call_operand.vmem [shape: f32[64,1], index: 2, kind: input, shape index: {}]   ;;  %s1566_s3 = inlined_call_operand.vmem [shape: s32[64,1], index: 3, kind: input, shape index: {}]   ;;  %s1567_s4 = inlined_call_operand.vmem [shape: f32[20,64], index: 4, kind: input, shape index: {}]   ;;  %s1568_s5 = inlined_call_operand.vmem [shape: f32[20,1], index: 5, kind: input, shape index: {}]   ;;  %s1569_s6 = inlined_call_operand.hbm [shape: f32[2,16,16], index: 6, kind: output, shape index: {0}]   ;;  %s1570_s7 = inlined_call_operand.hbm [shape: f32[2,4,16], index: 7, kind: output, shape index: {1}]   ;;  %s1571_s8 = inlined_call_operand.vmem [shape: f32[2,1,1,1], index: 8, kind: output, shape index: {2}]  }
   0x1   :  { %1572 = sst [smem:[#allocation8_spill]] %s1563_s0 }
   0x2   :  { %1573 = sst [smem:[#allocation9_spill]] %s1564_s1 }
   0x3   :  { %1574 = sst [smem:[#allocation10_spill]] %s1565_s2 }
   0x4   :  { %1575 = sst [smem:[#allocation11_spill]] %s1566_s3 }
   0x5   :  { %1576 = sst [smem:[#allocation12_spill]] %s1567_s4 }
   0x6   :  { %1577 = sst [smem:[#allocation13_spill]] %s1568_s5 }
   0x7   :  { %14 = vsyncpa [#allocation3], 0 }
   0x8   :  { %16 = vsyncpa [#allocation3 + $0x1], 0 }
   0x9   :  { %17 = vsyncpa [#allocation5], 0 }
   0xa   :  { %19 = vsyncpa [#allocation5 + $0x1], 0  ;;  %s1291_s27 = smov 0   ;;  %s1293_s28 = smov 0  }
   0xb   :  { %s1295_s29 = smov 0   ;;  %s1297_s30 = smov 0  }
   0xc   :  { %s1299_s9 = smov 0   ;;  %s1301_s10 = smov 0  }
   0xd LB: > { %s924_s11 = sadd.s32 4294967295, %s1235_s10   ;;  %s925_s12 = sadd.s32 4294967294, %s1235_s10   ;;  %s1235_s10 = sphi %s1301_s10, %s25_s10   ;;  %s1231_s9 = sphi %s1299_s9, %s1591_s9   ;;  %s1227_s30 = sphi %s1297_s30, %s1590_s30   ;;  %s1223_s29 = sphi %s1295_s29, %s1589_s29   ;;  %s1219_s28 = sphi %s1293_s28, %s1588_s28   ;;  %s1215_s27 = sphi %s1291_s27, %s1587_s27  }
   0xe   : > { %s37_s13 = sadd.s32 1, %s1231_s9  ;;  %s179_s14 = sadd.s32 1, %s1223_s29 }
   0xf   : > { %p39_p0 = scmp.ge.s32.totalorder %s37_s13, 2  ;;  %p189_p1 = scmp.ne.s32.totalorder %s1223_s29, %s1219_s28 }
  0x10   : > { %p190_p2 = scmp.eq.s32.totalorder %s924_s11, 1  ;;  %p195_p3 = scmp.ne.s32.totalorder %s1219_s28, %s1215_s27 }
  0x11   : > { %s1593_s13 = smov (%p39_p0, %s37_s13), 0  ;;  %p196_p5 = scmp.eq.s32.totalorder %s925_s12, 1 }
  0x12   : > { %p1331_p4 = por %p190_p2, %p189_p1  ;;  %s174_s16 = ssub.s32 %s1231_s9, %s1593_s13 }
  0x13   : > { %p928_p6 = scmp.ge.s32.totalorder %s1235_s10, 1  ;;  %p177_p7 = scmp.eq.s32.totalorder %s174_s16, 0 }
  0x14   : > { %p1338_p8 = por %p196_p5, %p195_p3  ;;  %p296_p9 = scmp.lt.s32.totalorder %s1235_s10, 3 }
  0x15   : > { %s1344_s18 = scalar_select %p177_p7, %s1223_s29, %s179_s14  }
  0x16   : > { %p297_p10 = pnand %p928_p6, %p296_p9 }
  0x17   : > { %p344_p11 = scmp.lt.s32.totalorder (!%p297_p10), %s1227_s30, 1  ;;  %s1580_s1 = sld [smem:[#allocation9_spill]] (!%p297_p10)  ;;  %vm416_vm0 = vcmask (!%p297_p10), 97280   ;;  %vm441_vm1 = vcmask (!%p297_p10), 1043456   ;;  %v1237_v1 = vmov (!%p297_p10), 0   ;;  %vm1238_vm2 = vmmov (!%p297_p10), 1  }
  0x18   : > { %300 = sbr.rel (%p297_p10) target bundleno = 701 (0x2bd), region = 44  ;;  %1124 = vset.pattern.permute.xlu1 (!%p297_p10), %v1237_v1  ;;  %1123 = vset.pattern.permute.xlu0 (!%p297_p10), %v1237_v1  ;;  %s1581_s2 = sld [smem:[#allocation10_spill]] (!%p297_p10)  ;;  %vm1025_vm3 = vmpackc.low (!%p297_p10), %vm441_vm1, %vm1238_vm2  ;;  %v1239_v31 = vmov (!%p297_p10), 0.0|0.0   ;;  %vm1240_vm4 = vmmov (!%p297_p10), 0   ;;  %v1241_v32 = vmov (!%p297_p10), 0.0   ;;  %v559_v41 = vlaneseq (!%p297_p10) }
  0x19   : > { %s1582_s0 = sld [smem:[#allocation8_spill]] (!%p297_p10)  ;;  %s1583_s3 = sld [smem:[#allocation11_spill]] (!%p297_p10)  ;;  %1046 = vmatprep.subr.bf16.mxu1 (!%p297_p10), %v1239_v31  ;;  %1018 = vmatprep.mubr.msk.f32.mxu1 (!%p297_p10), %vm1240_vm4, %v1241_v32  ;;  %vm632_vm1 = vcmask (!%p297_p10), 523264   ;;  %vm722_vm2 = vcmask (!%p297_p10), 130048  }
  0x1a   : > { %s1584_s5 = sld [smem:[#allocation13_spill]] (!%p297_p10)  ;;  %v560_v44 = vand.u32 (!%p297_p10), 127, %v559_v41  ;;  %s1585_s4 = sld [smem:[#allocation12_spill]] (!%p297_p10) }
  0x1b   : > { %s961_s25 = sshll.u32 (!%p297_p10), %s1227_s30, 8 }
  0x1c   : > { %s1485_s12 = scalar_lea.hbm (!%p297_p10), %s1569_s6, %s961_s25 }
  0x1d   : > { %v360_v0 = vld [vmem:[%s1580_s1] sm:$0xff] (!%p297_p10)  ;;  %v361_v10 = vld [vmem:[%s1580_s1 + $0x8] sm:$0xff] (!%p297_p10)  ;;  %v362_v12 = vld [vmem:[%s1580_s1 + $0x10] sm:$0xff] (!%p297_p10) }
  0x1e   : > { %987 = vmatprep.mubr.msk.f32.mxu0 (!%p297_p10), %vm416_vm0, %v360_v0  ;;  %v370_v2 = vld [vmem:[%s1581_s2 + $0x10] sm:$0xff] (!%p297_p10)  ;;  %v368_v3 = vld [vmem:[%s1581_s2] sm:$0xff] (!%p297_p10)  ;;  %v371_v4 = vld [vmem:[%s1581_s2 + $0x18] sm:$0xff] (!%p297_p10) }
  0x1f   : > { %s1352_s21 = scalar_select %p344_p11, %s1227_s30, 1  ;;  %388 = vperm.xlu1 %1124, %v370_v2   ;;  %378 = vperm.xlu0 %1123, %v368_v3   ;;  %v369_v7 = vld [vmem:[%s1581_s2 + $0x8] sm:$0xff]  ;;  %v563_v11 = vld [vmem:[%s1583_s3] sm:$0xff]  ;;  %v363_v14 = vld [vmem:[%s1580_s1 + $0x18] sm:$0xff] }
  0x20   : > { %v564_v9 = vld [vmem:[%s1583_s3 + $0x8] sm:$0xff]  ;;  %v372_v15 = vld [vmem:[%s1581_s2 + $0x20] sm:$0xff]  ;;  %v566_v17 = vld [vmem:[%s1583_s3 + $0x18] sm:$0xff] }
  0x21   : > { %s960_s24 = sshll.u32 %s1352_s21, 4  ;;  %v373_v13 = vld [vmem:[%s1581_s2 + $0x28] sm:$0xff]  ;;  %v364_v16 = vld [vmem:[%s1580_s1 + $0x20] sm:$0xff]  ;;  %v565_v19 = vld [vmem:[%s1583_s3 + $0x10] sm:$0xff] }
  0x22   : > { %s351_s14 = scalar_lea.vmem %s1582_s0, %s960_s24  ;;  %v365_v18 = vld [vmem:[%s1580_s1 + $0x28] sm:$0xff]  ;;  %v366_v20 = vld [vmem:[%s1580_s1 + $0x30] sm:$0xff]  ;;  %v375_v21 = vld [vmem:[%s1581_s2 + $0x38] sm:$0xff] }
  0x23   : > { %v358_v5 = vld [vmem:[%s351_s14] sm:$0xff]  ;;  %v359_v6 = vld [vmem:[%s351_s14 + $0x8] sm:$0xf]  ;;  %393 = vperm.xlu1 %1124, %v371_v4   ;;  %383 = vperm.xlu0 %1123, %v369_v7   ;;  %v367_v22 = vld [vmem:[%s1580_s1 + $0x38] sm:$0xff]  ;;  %s1467_s14 = sand.u32 1, %s1219_s28  }
  0x24   : > { %v1024_v8 = vpack.c.bf16 %v359_v6, %v358_v5  ;;  %v374_v23 = vld [vmem:[%s1581_s2 + $0x30] sm:$0xff]  ;;  %v568_v24 = vld [vmem:[%s1583_s3 + $0x28] sm:$0xff]  ;;  %v567_v25 = vld [vmem:[%s1583_s3 + $0x20] sm:$0xff]  ;;  %s929_s16 = sshll.u32 %s1467_s14, 4  ;;  %s930_s19 = sshll.u32 %s1467_s14, 2 }
  0x25   : > { %v570_v26 = vld [vmem:[%s1583_s3 + $0x38] sm:$0xff]  ;;  %v569_v27 = vld [vmem:[%s1583_s3 + $0x30] sm:$0xff]  ;;  %v615_v28 = vld [vmem:[%s1584_s5 + $0x8] sm:$0xff]  ;;  %s328_s20 = scalar_lea.vmem [#allocation2], %s929_s16  ;;  %s1475_s22 = scalar_lea.vmem [#allocation4], %s930_s19 }
  0x26   : > { %1026 = vmatprep.subr.msk.bf16.mxu0 %vm1025_vm3, %v1024_v8  ;;  %v614_v29 = vld [vmem:[%s1584_s5] sm:$0xff]  ;;  %v616_v30 = vld [vmem:[%s1584_s5 + $0x10] sm:$0xf]  ;;  %s770_s23 = sshll.u32 %s328_s20, 4  ;;  %s745_s16 = scalar_lea.sflag [#allocation3], %s1467_s14  ;;  %s1478_s23 = int_to_ptr.vmem [resolvable:$true] %s770_s23 }
  0x27   : > { %1029 = vmatpush3.bf16.msk.msra.mxu0 %vm1025_vm3, %v1024_v8  ;;  %575 = vperm.xlu1 %1124, %v564_v9   ;;  %vm725_vm3 = vcmask 125952   ;;  %s1125_s0 = scalar_lea.vmem %s1478_s23, 256  ;;  %s1242_s19 = smov [#allocation2]  }
  0x28   : > { %572 = vperm.xlu0 %1123, %v563_v11   ;;  %1030 = vmatprep.subr.bf16.mxu0 %v1239_v31  ;;  %p1126_p12 = scmp.ne.s32.totalorder %s1478_s23, %s1125_s0 }
  0x2a   : > { %988 = vmatmul.mubr.msk.f32.vlgmr.msra.gmra.mrb[0].mxu0 %vm416_vm0, %v361_v10  ;;  %p1127_p13 = pnand %p1126_p12, %p1331_p4 }
  0x2b   : > { %990 = vmatprep.mubr.msk.f32.mxu0 %vm416_vm0, %v362_v12  ;;  %403 = vperm.xlu1 %1124, %v373_v13  }
  0x2c   : > { %398 = vperm.xlu0 %1123, %v372_v15   ;;  %v611_v15 = vld [vmem:[%s1585_s4] sm:$0xff]  ;;  %p1128_p0 = pneg %p1127_p13 }
  0x2e   : > { %991 = vmatmul.mubr.msk.f32.gmra.mrb[2].mxu0 %vm416_vm0, %v363_v14 }
  0x2f   : > { %993 = vmatprep.mubr.msk.f32.mxu0 %vm416_vm0, %v364_v16  ;;  %581 = vperm.xlu1 %1124, %v566_v17   ;;  %v612_v16 = vld [vmem:[%s1585_s4 + $0x8] sm:$0xff]  ;;  %v613_v17 = vld [vmem:[%s1585_s4 + $0x10] sm:$0xf] }
  0x30   : > { %578 = vperm.xlu0 %1123, %v565_v19  }
  0x32   : > { %994 = vmatmul.mubr.msk.f32.gmra.mrb[4].mxu0 %vm416_vm0, %v365_v18 }
  0x33   : > { %996 = vmatprep.mubr.msk.f32.mxu0 %vm416_vm0, %v366_v20  ;;  %413 = vperm.xlu1 %1124, %v375_v21  }
  0x34   : > { %408 = vperm.xlu0 %1123, %v374_v23  }
  0x36   : > { %997 = vmatmul.mubr.msk.f32.gmra.mrb[6].mxu0 %vm416_vm0, %v367_v22 }
  0x37   : > { %587 = vperm.xlu1 %1124, %v568_v24   ;;  %1015 = vmatprep.mubr.msk.f32.mxu0 %vm1240_vm4, %v1241_v32 }
  0x38   : > { %584 = vperm.xlu0 %1123, %v567_v25  }
  0x3b   : > { %593 = vperm.xlu1 %1124, %v570_v26  }
  0x3c   : > { %590 = vperm.xlu0 %1123, %v569_v27  }
  0x3f   : > { %624 = vperm.xlu1 %1124, %v615_v28  }
  0x40   : > { %619 = vperm.xlu0 %1123, %v614_v29  }
  0x43   : > { %629 = vperm.xlu1 %1124, %v616_v30  }
  0x9e   : > { %v389_v33 = vpop.permute.xlu1 %388  ;;  %v379_v34 = vpop.permute.xlu0 %378 }
  0xa2   : > { %v394_v35 = vpop.permute.xlu1 %393  ;;  %v384_v36 = vpop.permute.xlu0 %383 }
  0xa6   : > { %v576_v37 = vpop.permute.xlu1 %575 }
  0xa7   : > { %v573_v38 = vpop.permute.xlu0 %572  ;;  %vm596_vm5 = vcmp.ge.s32.totalorder %v560_v44, %v576_v37 }
  0xa8   : > { %vm595_vm6 = vcmp.ge.s32.totalorder %v560_v44, %v573_v38 }
  0xa9   : > { %vm1032_vm7 = vmpackc.low %vm596_vm5, %vm595_vm6 }
  0xaa   : > { %v404_v39 = vpop.permute.xlu1 %403 }
  0xab   : > { %v399_v40 = vpop.permute.xlu0 %398 }
  0xae   : > { %v582_v42 = vpop.permute.xlu1 %581 }
  0xaf   : > { %v579_v43 = vpop.permute.xlu0 %578  ;;  %vm598_vm8 = vcmp.ge.s32.totalorder %v560_v44, %v582_v42 }
  0xb0   : > { %vm597_vm9 = vcmp.ge.s32.totalorder %v560_v44, %v579_v43 }
  0xb1   : > { %vm1036_vm10 = vmpackc.low %vm598_vm8, %vm597_vm9 }
  0xb2   : > { %v414_v48 = vpop.permute.xlu1 %413 }
  0xb3   : > { %v409_v50 = vpop.permute.xlu0 %408 }
  0xb6   : > { %v588_v59 = vpop.permute.xlu1 %587 }
  0xb7   : > { %v585_v62 = vpop.permute.xlu0 %584  ;;  %vm600_vm11 = vcmp.ge.s32.totalorder %v560_v44, %v588_v59 }
  0xb8   : > { %vm599_vm12 = vcmp.ge.s32.totalorder %v560_v44, %v585_v62 }
  0xb9   : > { %vm1040_vm13 = vmpackc.low %vm600_vm11, %vm599_vm12 }
  0xba   : > { %v594_v10 = vpop.permute.xlu1 %593 }
  0xbb   : > { %v591_v11 = vpop.permute.xlu0 %590  ;;  %vm602_vm14 = vcmp.ge.s32.totalorder %v560_v44, %v594_v10 }
  0xbc   : > { %vm601_vm15 = vcmp.ge.s32.totalorder %v560_v44, %v591_v11 }
  0xbd   : > { %vm1044_vm0 = vmpackc.low %vm602_vm14, %vm601_vm15 }
  0xbe   : > { %v625_v18 = vpop.permute.xlu1 %624 }
  0xbf   : > { %v620_v19 = vpop.permute.xlu0 %619 }
  0xc2   : > { %v630_v28 = vpop.permute.xlu1 %629 }
  0xfd   : > { %v989_v45 = vpop.f32.mrb[0].mxu0 }
  0xfe   : > { %v517_v46 = vadd.f32 %v989_v45, %v384_v36  ;;  %v511_v47 = vpop.f32.mrb[1].mxu0 }
  0xff   : > { %v512_v49 = vadd.f32 %v511_v47, %v379_v34 }
 0x100   : > { %v551_v51 = vmax.f32 %v517_v46, 0.0 }
 0x101   : > { %v550_v52 = vmax.f32 %v512_v49, 0.0  ;;  %v992_v53 = vpop.f32.mrb[2].mxu0 }
 0x102   : > { %v527_v54 = vadd.f32 %v992_v53, %v394_v35  ;;  %v521_v55 = vpop.f32.mrb[3].mxu0 }
 0x103   : > { %v1031_v56 = vpack.c.bf16 %v551_v51, %v550_v52  ;;  %v522_v57 = vadd.f32 %v521_v55, %v389_v33 }
 0x104   : > { %v553_v58 = vmax.f32 %v527_v54, 0.0 }
 0x105   : > { %v552_v60 = vmax.f32 %v522_v57, 0.0  ;;  %v995_v61 = vpop.f32.mrb[4].mxu0  ;;  %1033 = vmatpush3.bf16.msk.msra.mxu0 %vm1032_vm7, %v1031_v56  ;;  %1050 = vmatpush3.bf16.msk.msra.mxu1 %vm1032_vm7, %v1031_v56 }
 0x106   : > { %v537_v63 = vadd.f32 %v995_v61, %v404_v39  ;;  %v531_v0 = vpop.f32.mrb[5].mxu0  ;;  %1034 = vmatprep.subr.bf16.mxu0 %v1239_v31  ;;  %1047 = vmatprep.subr.bf16.mxu1 %v1239_v31 }
 0x107   : > { %v1035_v1 = vpack.c.bf16 %v553_v58, %v552_v60  ;;  %v532_v2 = vadd.f32 %v531_v0, %v399_v40 }
 0x108   : > { %v555_v3 = vmax.f32 %v537_v63, 0.0 }
 0x109   : > { %v554_v4 = vmax.f32 %v532_v2, 0.0  ;;  %v998_v5 = vpop.f32.mrb[6].mxu0  ;;  %1037 = vmatpush3.bf16.msk.msra.mxu0 %vm1036_vm10, %v1035_v1  ;;  %1051 = vmatpush3.bf16.msk.msra.mxu1 %vm1036_vm10, %v1035_v1 }
 0x10a   : > { %v547_v6 = vadd.f32 %v998_v5, %v414_v48  ;;  %v541_v7 = vpop.f32.mrb[7].mxu0  ;;  %1038 = vmatprep.subr.bf16.mxu0 %v1239_v31  ;;  %1048 = vmatprep.subr.bf16.mxu1 %v1239_v31 }
 0x10b   : > { %v1039_v8 = vpack.c.bf16 %v555_v3, %v554_v4  ;;  %v542_v9 = vadd.f32 %v541_v7, %v409_v50 }
 0x10c   : > { %v557_v12 = vmax.f32 %v547_v6, 0.0 }
 0x10d   : > { %v556_v13 = vmax.f32 %v542_v9, 0.0  ;;  %1041 = vmatpush3.bf16.msk.msra.mxu0 %vm1040_vm13, %v1039_v8  ;;  %1052 = vmatpush3.bf16.msk.msra.mxu1 %vm1040_vm13, %v1039_v8 }
 0x10e   : > { %1042 = vmatprep.subr.bf16.mxu0 %v1239_v31  ;;  %1049 = vmatprep.subr.bf16.mxu1 %v1239_v31 }
 0x10f   : > { %v1043_v14 = vpack.c.bf16 %v557_v12, %v556_v13 }
 0x111   : > { %1045 = vmatpush3.bf16.msk.msra.mxu0 %vm1044_vm0, %v1043_v14  ;;  %1053 = vmatpush3.bf16.msk.msra.mxu1 %vm1044_vm0, %v1043_v14 }
 0x114   : > { %1016 = vmatmul.mubr.msk.f32.vlgmr.msra.gmra.mrb[8].mxu0 %vm632_vm1, %v611_v15  ;;  %1019 = vmatmul.mubr.msk.f32.vlgmr.msra.gmra.mrb[0].mxu1 %vm632_vm1, %v612_v16 }
 0x115   : > { %1021 = vmatprep.mubr.msk.f32.mxu1 %vm1240_vm4, %v1241_v32 }
 0x118   : > { %1022 = vmatmul.mubr.msk.f32.gmra.mrb[2].mxu1 %vm632_vm1, %v613_v17 }
 0x1e7   : > { %v708_v20 = vpop.f32.mrb[8].mxu0  ;;  %v713_v21 = vpop.f32.mrb[0].mxu1 }
 0x1e8   : > { %v709_v22 = vadd.f32 %v708_v20, %v620_v19  ;;  %v714_v23 = vadd.f32 %v713_v21, %v625_v18  ;;  %v1017_v24 = vpop.f32.mrb[9].mxu0  ;;  %v1020_v25 = vpop.f32.mrb[1].mxu1 }
 0x1ea   : > { %723 = vst.msk [vmem:[%s328_s20] sm:$0xff] %vm722_vm2, %v709_v22  ;;  %v727_v26 = vand.u32 2147483647, %v709_v22  ;;  %724 = vst.msk [vmem:[%s328_s20 + $0x8] sm:$0xff] %vm722_vm2, %v714_v23  ;;  %v728_v27 = vand.u32 2147483647, %v714_v23 }
 0x1eb   : > { %v718_v29 = vpop.f32.mrb[2].mxu1  ;;  %s1129_s20 = sshll.u32 %s1242_s19, 4  ;;  %s1130_s20 = int_to_ptr.vmem [resolvable:$false] %s1129_s20 }
 0x1ec   : > { %v719_v30 = vadd.f32 %v718_v29, %v630_v28  ;;  %v729_v31 = vsel %vm722_vm2, %v727_v26, 0.0  ;;  %v730_v32 = vsel %vm722_vm2, %v728_v27, 0.0  ;;  %v1023_v33 = vpop.f32.mrb[3].mxu1  ;;  %s1131_s1 = scalar_lea.vmem %s1130_s20, 512  ;;  %p1132_p1 = scmp.lt.s32.totalorder %s1478_s23, %s1130_s20 }
 0x1ed   : > { %v731_v34 = vadd.f32 %v730_v32, %v729_v31  ;;  %p1133_p2 = scmp.lt.s32.totalorder %s1131_s1, %s1125_s0 }
 0x1ee   : > { %726 = vst.msk [vmem:[%s1475_s22] sm:$0xf] %vm725_vm3, %v719_v30 }
 0x1ef   : > { %732 = vadd.xlane.f32.xlu0 %v731_v34  ;;  %p1134_p3 = por %p1133_p2, %p1132_p1 }
 0x1f1   : > { %p1135_p5 = pnand %p1134_p3, %p1128_p0 }
 0x1f3   : > { %1138 = shalt.err (!%p1135_p5)
}
 0x1f4   : > { %s1139_s25 = scalar_lea.hbm %s1485_s12, 256  ;;  %s1143_s19 = scalar_lea.hbm %s1569_s6, 512 }
 0x1f5   : > { %p1140_p6 = scmp.ne.s32.totalorder %s1485_s12, %s1139_s25  ;;  %p1144_p10 = scmp.lt.u32.totalorder %s1485_s12, %s1569_s6 }
 0x1f6   : > { %p1145_p11 = scmp.lt.u32.totalorder %s1143_s19, %s1139_s25  ;;  %p1147_p13 = scmp.lt.u32.totalorder %s1139_s25, %s1485_s12 }
 0x1f7   : > { %p1141_p7 = pnand %p1140_p6, %p1331_p4 }
 0x1f8   : > { %p1146_p12 = por %p1145_p11, %p1144_p10 }
 0x1f9   : > { %p1142_p9 = pneg %p1141_p7 }
 0x1fa   : > { %p1148_p0 = por %p1147_p13, %p1146_p12 }
 0x1fc   : > { %p1149_p1 = pnand %p1148_p0, %p1142_p9 }
 0x1fe   : > { %1152 = shalt.err (!%p1149_p1)
}
 0x1ff   : > { %s1243_s0 = smov 128   ;;  %s1244_s1 = smov 8  }
 0x200   : > { %1056 = dma.vmem_to_hbm [thread:$0]  (%p1331_p4), %s1478_s23, 256, %s1485_s12, %s745_s16, %s1243_s0, %s1243_s0, %s1244_s1  }
 0x201   : > { %s1586_s24 = sshll.u32 %s1227_s30, 6  ;;  %s787_s19 = sshll.u32 %s1475_s22, 4  ;;  %s788_s19 = int_to_ptr.vmem [resolvable:$true] %s787_s19 }
 0x202   : > { %s1516_s25 = scalar_lea.hbm %s1570_s7, %s1586_s24  ;;  %s750_s20 = scalar_lea.sflag [#allocation5], %s1467_s14 }
 0x203   : > { %s1153_s2 = scalar_lea.vmem %s788_s19, 64  ;;  %s1245_s3 = smov [#allocation4]  }
 0x204   : > { %p1154_p2 = scmp.ne.s32.totalorder %s788_s19, %s1153_s2  ;;  %s1157_s4 = sshll.u32 %s1245_s3, 4  ;;  %s1158_s4 = int_to_ptr.vmem [resolvable:$false] %s1157_s4 }
 0x205   : > { %s1159_s5 = scalar_lea.vmem %s1158_s4, 128  ;;  %p1160_p6 = scmp.lt.s32.totalorder %s788_s19, %s1158_s4 }
 0x206   : > { %p1155_p3 = pnand %p1154_p2, %p1331_p4  ;;  %p1161_p7 = scmp.lt.s32.totalorder %s1159_s5, %s1153_s2 }
 0x208   : > { %p1156_p5 = pneg %p1155_p3  ;;  %p1162_p9 = por %p1161_p7, %p1160_p6 }
 0x20a   : > { %p1163_p10 = pnand %p1162_p9, %p1156_p5 }
 0x20c   : > { %1166 = shalt.err (!%p1163_p10)
}
 0x20d   : > { %s1167_s30 = scalar_lea.hbm %s1516_s25, 64  ;;  %s1171_s3 = scalar_lea.hbm %s1570_s7, 128 }
 0x20e   : > { %p1168_p11 = scmp.ne.s32.totalorder %s1516_s25, %s1167_s30  ;;  %p1172_p0 = scmp.lt.u32.totalorder %s1516_s25, %s1570_s7 }
 0x20f   : > { %p1173_p1 = scmp.lt.u32.totalorder %s1171_s3, %s1167_s30  ;;  %p1175_p3 = scmp.lt.u32.totalorder %s1167_s30, %s1516_s25 }
 0x210   : > { %p1169_p12 = pnand %p1168_p11, %p1331_p4 }
 0x211   : > { %p1174_p2 = por %p1173_p1, %p1172_p0 }
 0x212   : > { %p1170_p13 = pneg %p1169_p12 }
 0x213   : > { %p1176_p5 = por %p1175_p3, %p1174_p2 }
 0x215   : > { %p1177_p6 = pnand %p1176_p5, %p1170_p13 }
 0x217   : > { %1180 = shalt.err (!%p1177_p6)
}
 0x218   : > { %1057 = dma.vmem_to_hbm [thread:$0]  (%p1331_p4), %s788_s19, 64, %s1516_s25, %s750_s20   ;;  %vm742_vm4 = vcmask 0  }
 0x219   : > { %s357_s12 = scalar_lea.vmem %s1571_s8, %s1352_s21 }
 0x27c   : > { %v733_v35 = vpop.xlane.xlu0 %732 }
 0x27d   : > { %v734_v36 = vrot.slane %v733_v35, 4 }
 0x27f   : > { %v735_v37 = vadd.f32 %v734_v36, %v733_v35 }
 0x281   : > { %v736_v38 = vrot.slane %v735_v37, 2 }
 0x283   : > { %v737_v39 = vadd.f32 %v736_v38, %v735_v37 }
 0x285   : > { %v738_v40 = vrot.slane %v737_v39, 1 }
 0x287   : > { %v739_v41 = vadd.f32 %v738_v40, %v737_v39 }
 0x289   : > { %1054 = vpush %v739_v41 }
 0x2ba   : > { %s1055_s16 = spop %1054 }
 0x2bb   : > { %v741_v42 = vstv %s1055_s16 }
 0x2bc   : > { %743 = vst.msk [vmem:[%s357_s12] sm:$0x1] %vm742_vm4, %v741_v42 }
 0x2bd PF: > { %p1067_p4 = scmp.ge.s32.totalorder %s1235_s10, 2  ;;  %s802_s15 = sand.u32 1, %s1215_s27  }
 0x2be   : > { %s803_s0 = scalar_lea.sflag [#allocation3], %s802_s15 }
 0x2bf   : > { %p1061_p7 = pnand %p1067_p4, %p1338_p8 }
 0x2c1   : > { %1206 = dma.done.wait (!%p1061_p7), %s803_s0, 256  }
 0x2c2   : > { %1208 = vsyncadd (!%p1061_p7), %s803_s0, 4294967040  ;;  %s812_s1 = scalar_lea.sflag [#allocation5], %s802_s15 }
 0x2c3   : > { %1210 = dma.done.wait (!%p1061_p7), %s812_s1, 64  }
 0x2c4   : > { %1212 = vsyncadd (!%p1061_p7), %s812_s1, 4294967232  ;;  %s25_s10 = sadd.s32 1, %s1235_s10   ;;  %s1587_s27 = smov %s1219_s28 }
 0x2c5   : > { %p22_p9 = scmp.ge.s32.totalorder %s25_s10, 4   ;;  %s1588_s28 = smov %s1223_s29 }
 0x2c6   : > { %s1589_s29 = smov %s1344_s18  ;;  %s1590_s30 = smov %s1231_s9 }
 0x2c7   : > { %s1591_s9 = smov %s1593_s13  ;;  %24 = sbr.rel (!%p22_p9) target bundleno = 13 (0xd), region = 108 }
 0x2ce   :  { %826 = vsyncpa [#allocation3], 1 }
 0x2cf   :  { %828 = vsyncpa [#allocation3 + $0x1], 1 }
 0x2d0   :  { %829 = vsyncpa [#allocation5], 1 }
 0x2d1   :  { %831 = vsyncpa [#allocation5 + $0x1], 1 }

</bundles_post_ra>
